<compile_context>
chip_gen: v7x
topology: tpu7x:2x2x1
jax: 0.10.0
libtpu: 0.0.40
codegen_flags: <defaults>
</compile_context>

<pallas_src>
import math

import jax
import jax.numpy as jnp
from jax import lax
from jax.experimental import pallas as pl
from jax.experimental.pallas import tpu as pltpu


def _make_muff_kernel(num_layer, seq_len, hidden):
    """Per-batch-element fused conv-stack kernel."""
    nl1 = num_layer - 1

    def kernel(x_ref, w0_ref, b0_ref, wr_ref, br_ref, o_ref, act_ref):
        # x_ref block: (1, L, C_in) -> (L, C_in) slab for this batch element.
        x = x_ref[0]

        # Layer 0: Conv1d(kernel_size=1) == pointwise linear over channels.
        a = jnp.tanh(
            jnp.dot(x, w0_ref[...], preferred_element_type=jnp.float32)
            + b0_ref[...])
        act_ref[...] = a  # keep activation in VMEM scratch between layers

        zero_row = jnp.zeros((1, hidden), jnp.float32)

        # Layers 1..num_layer-1: Conv1d(kernel_size=3, padding=1).
        # out[t] = x[t-1] @ W0^T + x[t] @ W1^T + x[t+1] @ W2^T + b
        # fused as one (L, 3H) x (3H, H) matmul.
        for li in range(nl1):
            a = act_ref[...]                                           # (L, H)
            a_prev = jnp.concatenate([zero_row, a[:-1, :]], axis=0)    # x[t-1]
            a_next = jnp.concatenate([a[1:, :], zero_row], axis=0)     # x[t+1]
            xcat = jnp.concatenate([a_prev, a, a_next], axis=-1)       # (L, 3H)
            y = jnp.dot(xcat, wr_ref[li],
                        preferred_element_type=jnp.float32) + br_ref[li]
            act_ref[...] = jnp.tanh(y)
            # TODO(synk): dropout(p=0.5) on each layer output omitted (eval mode).

        o_ref[0] = act_ref[...].astype(o_ref.dtype)

    return kernel


def muff_forward(x, conv0, convs):
    """Pallas MUFFmodel forward.

    x:      (B, L, C_in) float32  -- same layout as the PyTorch module input.
    conv0:  (W0, b0) with W0 (H, C_in, 1), b0 (H,)   [Conv1d k=1]
    convs:  list of (W, b) with W (H, H, 3), b (H,)  [Conv1d k=3, padding=1]
    returns (B, L, H)
    """
    B, L, C_in = x.shape
    W0, b0 = conv0
    H = W0.shape[0]
    num_layer = 1 + len(convs)

    # Pre-pack weights: layer 0 transposed so y = x @ w0_t + b.
    w0_t = jnp.asarray(W0[:, :, 0].T)          # (C_in, H)
    b0_r = jnp.asarray(b0).reshape(1, H)       # (1, H)

    # k=3 layers: fuse the 3 taps along the contraction axis.
    # wr[li, k*H + i, o] = W_li[o, i, k]  -> operand is [x[t-1] | x[t] | x[t+1]].
    if convs:
        wr = jnp.stack([W.transpose(2, 1, 0).reshape(3 * H, H) for (W, _) in convs])
        br = jnp.stack([b.reshape(1, H) for (_, b) in convs])
    else:  # keep pallas_call arity fixed; kernel never reads these.
        wr = jnp.zeros((1, 3 * H, H), jnp.float32)
        br = jnp.zeros((1, 1, H), jnp.float32)
    NL = wr.shape[0]

    kernel = _make_muff_kernel(num_layer, L, H)

    x_spec = pl.BlockSpec((1, L, C_in), lambda b: (b, 0, 0))
    w0_spec = pl.BlockSpec((C_in, H), lambda b: (0, 0))
    b0_spec = pl.BlockSpec((1, H), lambda b: (0, 0))
    wr_spec = pl.BlockSpec((NL, 3 * H, H), lambda b: (0, 0, 0))
    br_spec = pl.BlockSpec((NL, 1, H), lambda b: (0, 0, 0))
    out_spec = pl.BlockSpec((1, L, H), lambda b: (b, 0, 0))

    out = pl.pallas_call(
        kernel,
        out_shape=jax.ShapeDtypeStruct((B, L, H), x.dtype),
        grid_spec=pltpu.PrefetchScalarGridSpec(
            num_scalar_prefetch=0,
            grid=(B,),
            in_specs=[x_spec, w0_spec, b0_spec, wr_spec, br_spec],
            out_specs=out_spec,
            scratch_shapes=[pltpu.VMEM((L, H), jnp.float32)],
        ),
        compiler_params=pltpu.CompilerParams(
            dimension_semantics=("parallel",),
            vmem_limit_bytes=32 * 1024 * 1024,
        ),
    )(x, w0_t, b0_r, wr, br)
    return out


def _reference(x, conv0, convs):
    """Plain-JAX replica of the PyTorch forward (eval mode) for checking."""
    W0, b0 = conv0
    a = jnp.transpose(x, (0, 2, 1))  # (B, C_in, L)  -- torch's transpose(2, 1)
    a = jnp.tanh(
        lax.conv_general_dilated(a, W0, window_strides=(1,), padding=[(0, 0)],
                                 dimension_numbers=("NCH", "OIH", "NCH"))
        + b0[None, :, None])
    for (W, b) in convs:
        a = jnp.tanh(
            lax.conv_general_dilated(a, W, window_strides=(1,), padding=[(1, 1)],
                                     dimension_numbers=("NCH", "OIH", "NCH"))
            + b[None, :, None])
    return jnp.transpose(a, (0, 2, 1))  # back to (B, L, H)


def init_params(key, input_dim, hidden_dim, num_layer):
    """Deterministic PyTorch-Conv1d-style uniform init."""
    keys = jax.random.split(key, 2 * num_layer)
    bound0 = 1.0 / math.sqrt(input_dim * 1)
    W0 = jax.random.uniform(keys[0], (hidden_dim, input_dim, 1),
                            minval=-bound0, maxval=bound0, dtype=jnp.float32)
    b0 = jax.random.uniform(keys[1], (hidden_dim,),
                            minval=-bound0, maxval=bound0, dtype=jnp.float32)
    convs = []
    boundk = 1.0 / math.sqrt(hidden_dim * 3)
    for li in range(num_layer - 1):
        W = jax.random.uniform(keys[2 + 2 * li], (hidden_dim, hidden_dim, 3),
                               minval=-boundk, maxval=boundk, dtype=jnp.float32)
        b = jax.random.uniform(keys[3 + 2 * li], (hidden_dim,),
                               minval=-boundk, maxval=boundk, dtype=jnp.float32)
        convs.append((W, b))
    return (W0, b0), convs


if __name__ == "__main__":
    B, L, C_IN, HIDDEN, NUM_LAYER = 2, 16, 8, 32, 3

    root = jax.random.PRNGKey(0)
    k_x, k_p = jax.random.split(root, 2)

    x = jax.random.normal(k_x, (B, L, C_IN), dtype=jnp.float32)
    conv0, convs = init_params(k_p, C_IN, HIDDEN, NUM_LAYER)

    out = muff_forward(x, conv0, convs)
    out = jax.block_until_ready(out)

    ref = _reference(x, conv0, convs)
    assert out.shape == (B, L, HIDDEN)
    assert jnp.allclose(out, ref, atol=1e-4, rtol=1e-4), "mismatch vs reference"

    print("KERNEL_OK")
</pallas_src>

<mosaic_0001>
module attributes {stable_mosaic.version = 11 : i64} {
  func.func @kernel(%arg0: i32, %arg1: memref<1x16x8xf32, #tpu.memory_space<vmem>>, %arg2: memref<8x32xf32, #tpu.memory_space<vmem>>, %arg3: memref<1x32xf32, #tpu.memory_space<vmem>>, %arg4: memref<2x96x32xf32, #tpu.memory_space<vmem>>, %arg5: memref<2x1x32xf32, #tpu.memory_space<vmem>>, %arg6: memref<1x16x32xf32, #tpu.memory_space<vmem>>, %arg7: memref<16x32xf32, #tpu.memory_space<vmem>>) attributes {dimension_semantics = [#tpu.dimension_semantics<parallel>], iteration_bounds = array<i64: 2>, scalar_prefetch = 0 : i64, scratch_operands = 1 : i64, tpu.core_type = #tpu.core_type<tc>, window_params = [{transform_indices = @transform_0, window_bounds = array<i64: 1, 16, 8>}, {pipeline_mode = #tpu.pipeline_mode<synchronous>, transform_indices = @transform_1, window_bounds = array<i64: 8, 32>}, {pipeline_mode = #tpu.pipeline_mode<synchronous>, transform_indices = @transform_2, window_bounds = array<i64: 1, 32>}, {pipeline_mode = #tpu.pipeline_mode<synchronous>, transform_indices = @transform_3, window_bounds = array<i64: 2, 96, 32>}, {pipeline_mode = #tpu.pipeline_mode<synchronous>, transform_indices = @transform_4, window_bounds = array<i64: 2, 1, 32>}, {transform_indices = @transform_5, window_bounds = array<i64: 1, 16, 32>}]} {
    %c0 = arith.constant 0 : index
    %c0_0 = arith.constant 0 : index
    %c0_1 = arith.constant 0 : index
    %0 = vector.load %arg1[%c0, %c0_0, %c0_1] : memref<1x16x8xf32, #tpu.memory_space<vmem>>, vector<1x16x8xf32>
    %1 = vector.shape_cast %0 : vector<1x16x8xf32> to vector<16x8xf32>
    %c0_2 = arith.constant 0 : index
    %c0_3 = arith.constant 0 : index
    %2 = vector.load %arg2[%c0_2, %c0_3] : memref<8x32xf32, #tpu.memory_space<vmem>>, vector<8x32xf32>
    %cst = arith.constant dense<0.000000e+00> : vector<16x32xf32>
    %3 = tpu.matmul %1, %2, %cst {dimension_numbers = #tpu.dot_dimension_numbers<[1], [0], [0], [1], [0, 0, 1, 1], [], []>} : vector<16x8xf32>, vector<8x32xf32>, vector<16x32xf32> -> vector<16x32xf32>
    %c0_4 = arith.constant 0 : index
    %c0_5 = arith.constant 0 : index
    %4 = vector.load %arg3[%c0_4, %c0_5] : memref<1x32xf32, #tpu.memory_space<vmem>>, vector<1x32xf32>
    %5 = vector.broadcast %4 : vector<1x32xf32> to vector<16x32xf32>
    %6 = arith.addf %3, %5 : vector<16x32xf32>
    %7 = math.tanh %6 : vector<16x32xf32>
    %c0_6 = arith.constant 0 : index
    %c0_7 = arith.constant 0 : index
    %8 = vector.load %arg7[%c0_6, %c0_7] : memref<16x32xf32, #tpu.memory_space<vmem>>, vector<16x32xf32>
    tpu.vector_store %arg7[%c0_6, %c0_7], %7 {strides = array<i32>} : memref<16x32xf32, #tpu.memory_space<vmem>>, vector<16x32xf32>,
    %cst_8 = arith.constant 0.000000e+00 : f32
    %9 = vector.broadcast %cst_8 : f32 to vector<1x32xf32>
    %c0_9 = arith.constant 0 : index
    %c0_10 = arith.constant 0 : index
    %10 = vector.load %arg7[%c0_9, %c0_10] : memref<16x32xf32, #tpu.memory_space<vmem>>, vector<16x32xf32>
    %11 = vector.extract_strided_slice %10 {offsets = [0, 0], sizes = [15, 32], strides = [1, 1]} : vector<16x32xf32> to vector<15x32xf32>
    %12 = tpu.concatenate %9, %11 in 0 : vector<1x32xf32>, vector<15x32xf32> -> vector<16x32xf32>
    %13 = vector.extract_strided_slice %10 {offsets = [1, 0], sizes = [15, 32], strides = [1, 1]} : vector<16x32xf32> to vector<15x32xf32>
    %14 = tpu.concatenate %13, %9 in 0 : vector<15x32xf32>, vector<1x32xf32> -> vector<16x32xf32>
    %15 = tpu.concatenate %12, %10, %14 in 1 : vector<16x32xf32>, vector<16x32xf32>, vector<16x32xf32> -> vector<16x96xf32>
    %c0_11 = arith.constant 0 : index
    %c0_12 = arith.constant 0 : index
    %c0_13 = arith.constant 0 : index
    %16 = vector.load %arg4[%c0_11, %c0_12, %c0_13] : memref<2x96x32xf32, #tpu.memory_space<vmem>>, vector<1x96x32xf32>
    %17 = vector.shape_cast %16 : vector<1x96x32xf32> to vector<96x32xf32>
    %cst_14 = arith.constant dense<0.000000e+00> : vector<16x32xf32>
    %18 = tpu.matmul %15, %17, %cst_14 {dimension_numbers = #tpu.dot_dimension_numbers<[1], [0], [0], [1], [0, 0, 1, 1], [], []>} : vector<16x96xf32>, vector<96x32xf32>, vector<16x32xf32> -> vector<16x32xf32>
    %c0_15 = arith.constant 0 : index
    %c0_16 = arith.constant 0 : index
    %c0_17 = arith.constant 0 : index
    %19 = vector.load %arg5[%c0_15, %c0_16, %c0_17] : memref<2x1x32xf32, #tpu.memory_space<vmem>>, vector<1x1x32xf32>
    %20 = vector.shape_cast %19 : vector<1x1x32xf32> to vector<1x32xf32>
    %21 = vector.broadcast %20 : vector<1x32xf32> to vector<16x32xf32>
    %22 = arith.addf %18, %21 : vector<16x32xf32>
    %23 = math.tanh %22 : vector<16x32xf32>
    %c0_18 = arith.constant 0 : index
    %c0_19 = arith.constant 0 : index
    %24 = vector.load %arg7[%c0_18, %c0_19] : memref<16x32xf32, #tpu.memory_space<vmem>>, vector<16x32xf32>
    tpu.vector_store %arg7[%c0_18, %c0_19], %23 {strides = array<i32>} : memref<16x32xf32, #tpu.memory_space<vmem>>, vector<16x32xf32>,
    %c0_20 = arith.constant 0 : index
    %c0_21 = arith.constant 0 : index
    %25 = vector.load %arg7[%c0_20, %c0_21] : memref<16x32xf32, #tpu.memory_space<vmem>>, vector<16x32xf32>
    %26 = vector.extract_strided_slice %25 {offsets = [0, 0], sizes = [15, 32], strides = [1, 1]} : vector<16x32xf32> to vector<15x32xf32>
    %27 = tpu.concatenate %9, %26 in 0 : vector<1x32xf32>, vector<15x32xf32> -> vector<16x32xf32>
    %28 = vector.extract_strided_slice %25 {offsets = [1, 0], sizes = [15, 32], strides = [1, 1]} : vector<16x32xf32> to vector<15x32xf32>
    %29 = tpu.concatenate %28, %9 in 0 : vector<15x32xf32>, vector<1x32xf32> -> vector<16x32xf32>
    %30 = tpu.concatenate %27, %25, %29 in 1 : vector<16x32xf32>, vector<16x32xf32>, vector<16x32xf32> -> vector<16x96xf32>
    %c1 = arith.constant 1 : index
    %c0_22 = arith.constant 0 : index
    %c0_23 = arith.constant 0 : index
    %31 = vector.load %arg4[%c1, %c0_22, %c0_23] : memref<2x96x32xf32, #tpu.memory_space<vmem>>, vector<1x96x32xf32>
    %32 = vector.shape_cast %31 : vector<1x96x32xf32> to vector<96x32xf32>
    %cst_24 = arith.constant dense<0.000000e+00> : vector<16x32xf32>
    %33 = tpu.matmul %30, %32, %cst_24 {dimension_numbers = #tpu.dot_dimension_numbers<[1], [0], [0], [1], [0, 0, 1, 1], [], []>} : vector<16x96xf32>, vector<96x32xf32>, vector<16x32xf32> -> vector<16x32xf32>
    %c1_25 = arith.constant 1 : index
    %c0_26 = arith.constant 0 : index
    %c0_27 = arith.constant 0 : index
    %34 = vector.load %arg5[%c1_25, %c0_26, %c0_27] : memref<2x1x32xf32, #tpu.memory_space<vmem>>, vector<1x1x32xf32>
    %35 = vector.shape_cast %34 : vector<1x1x32xf32> to vector<1x32xf32>
    %36 = vector.broadcast %35 : vector<1x32xf32> to vector<16x32xf32>
    %37 = arith.addf %33, %36 : vector<16x32xf32>
    %38 = math.tanh %37 : vector<16x32xf32>
    %c0_28 = arith.constant 0 : index
    %c0_29 = arith.constant 0 : index
    %39 = vector.load %arg7[%c0_28, %c0_29] : memref<16x32xf32, #tpu.memory_space<vmem>>, vector<16x32xf32>
    tpu.vector_store %arg7[%c0_28, %c0_29], %38 {strides = array<i32>} : memref<16x32xf32, #tpu.memory_space<vmem>>, vector<16x32xf32>,
    %c0_30 = arith.constant 0 : index
    %c0_31 = arith.constant 0 : index
    %40 = vector.load %arg7[%c0_30, %c0_31] : memref<16x32xf32, #tpu.memory_space<vmem>>, vector<16x32xf32>
    %c0_32 = arith.constant 0 : index
    %c0_33 = arith.constant 0 : index
    %c0_34 = arith.constant 0 : index
    %41 = vector.load %arg6[%c0_32, %c0_33, %c0_34] : memref<1x16x32xf32, #tpu.memory_space<vmem>>, vector<1x16x32xf32>
    %42 = vector.shape_cast %41 : vector<1x16x32xf32> to vector<16x32xf32>
    %43 = vector.shape_cast %40 : vector<16x32xf32> to vector<1x16x32xf32>
    tpu.vector_store %arg6[%c0_32, %c0_33, %c0_34], %43 {strides = array<i32>} : memref<1x16x32xf32, #tpu.memory_space<vmem>>, vector<1x16x32xf32>,
    return
  }
  func.func @transform_0(%arg0: i32) -> (i32, i32, i32) {
    %c0_i32 = arith.constant 0 : i32
    %c0_i32_0 = arith.constant 0 : i32
    %c0_i32_1 = arith.constant 0 : i32
    return %arg0, %c0_i32, %c0_i32_0 : i32, i32, i32
  }
  func.func @transform_1(%arg0: i32) -> (i32, i32) {
    %c0_i32 = arith.constant 0 : i32
    %c0_i32_0 = arith.constant 0 : i32
    %c0_i32_1 = arith.constant 0 : i32
    return %c0_i32, %c0_i32_0 : i32, i32
  }
  func.func @transform_2(%arg0: i32) -> (i32, i32) {
    %c0_i32 = arith.constant 0 : i32
    %c0_i32_0 = arith.constant 0 : i32
    %c0_i32_1 = arith.constant 0 : i32
    return %c0_i32, %c0_i32_0 : i32, i32
  }
  func.func @transform_3(%arg0: i32) -> (i32, i32, i32) {
    %c0_i32 = arith.constant 0 : i32
    %c0_i32_0 = arith.constant 0 : i32
    %c0_i32_1 = arith.constant 0 : i32
    %c0_i32_2 = arith.constant 0 : i32
    return %c0_i32, %c0_i32_0, %c0_i32_1 : i32, i32, i32
  }
  func.func @transform_4(%arg0: i32) -> (i32, i32, i32) {
    %c0_i32 = arith.constant 0 : i32
    %c0_i32_0 = arith.constant 0 : i32
    %c0_i32_1 = arith.constant 0 : i32
    %c0_i32_2 = arith.constant 0 : i32
    return %c0_i32, %c0_i32_0, %c0_i32_1 : i32, i32, i32
  }
  func.func @transform_5(%arg0: i32) -> (i32, i32, i32) {
    %c0_i32 = arith.constant 0 : i32
    %c0_i32_0 = arith.constant 0 : i32
    %c0_i32_1 = arith.constant 0 : i32
    return %arg0, %c0_i32, %c0_i32_0 : i32, i32, i32
  }
}

</mosaic_0001>

<bundles_post_ra>
// kernel: tpu_custom_call.1
= control target key start
LH: loop header
LB: loop body
LE: loop exit
PB: predicated region body
PF: predicated region fallthrough
CT: control target
= control target key end

     0   :  { %10 = vsyncpa [#allocation4], 0  ;;  %s1229_s0 = inlined_call_operand.vmem [shape: f32[2,16,8], index: 0, kind: input, shape index: {}]   ;;  %s1230_s1 = inlined_call_operand.vmem [shape: f32[8,32], index: 1, kind: input, shape index: {}]   ;;  %s1231_s2 = inlined_call_operand.vmem [shape: f32[1,32], index: 2, kind: input, shape index: {}]   ;;  %s1232_s3 = inlined_call_operand.vmem [shape: f32[2,96,32], index: 3, kind: input, shape index: {}]   ;;  %s1233_s4 = inlined_call_operand.vmem [shape: f32[2,1,32], index: 4, kind: input, shape index: {}]   ;;  %s1234_s5 = inlined_call_operand.hbm [shape: f32[2,16,32], index: 5, kind: output, shape index: {}]  }
   0x1   :  { %12 = vsyncpa [#allocation4 + $0x1], 0  ;;  %s1006_s18 = smov 0   ;;  %s1008_s19 = smov 0  }
   0x2   :  { %s1010_s20 = smov 0   ;;  %s1012_s21 = smov 0  }
   0x3 LB: > { %s1027_s22 = sadd.s32 4294967295, %s969_s21   ;;  %s678_s23 = sadd.s32 4294967294, %s969_s21   ;;  %s969_s21 = sphi %s1012_s21, %s1240_s21   ;;  %s965_s20 = sphi %s1010_s20, %s1239_s20   ;;  %s961_s19 = sphi %s1008_s19, %s1238_s19   ;;  %s957_s18 = sphi %s1006_s18, %s1237_s18  }
   0x4   : > { %s1031_s24 = sadd.s32 1, %s969_s21   ;;  %s135_s25 = sadd.s32 1, %s965_s20 }
   0x5   : > { %s132_s26 = ssub.s32 %s969_s21, %s1031_s24  ;;  %p145_p0 = scmp.ne.s32.totalorder %s965_s20, %s961_s19 }
   0x6   : > { %p133_p1 = scmp.eq.s32.totalorder %s132_s26, 0  ;;  %p146_p2 = scmp.eq.s32.totalorder %s1027_s22, 1 }
   0x7   : > { %p151_p3 = scmp.ne.s32.totalorder %s961_s19, %s957_s18  ;;  %p152_p4 = scmp.eq.s32.totalorder %s678_s23, 1 }
   0x8   : > { %s1042_s27 = scalar_select %p133_p1, %s965_s20, %s135_s25  }
   0x9   : > { %p1044_p5 = por %p146_p2, %p145_p0  ;;  %p1048_p6 = por %p152_p4, %p151_p3 }
   0xa   : > { %p681_p7 = scmp.ge.s32.totalorder %s969_s21, 1  ;;  %p190_p8 = scmp.lt.s32.totalorder %s969_s21, 3 }
   0xc   : > { %p191_p9 = pnand %p681_p7, %p190_p8 }
   0xd   : > { %v225_v0 = vld [vmem:[%s1230_s1] sm:$0xff] (!%p191_p9)  ;;  %p218_p10 = scmp.lt.s32.totalorder (!%p191_p9), %s1027_s22, 1  ;;  %vm233_vm0 = vcmask (!%p191_p9), 64512   ;;  %v356_v4 = vld [vmem:[%s1232_s3 + $0x8] sm:$0xff] (!%p191_p9)  ;;  %v357_v5 = vld [vmem:[%s1232_s3 + $0x10] sm:$0xff] (!%p191_p9)  ;;  %vm317_vm1 = vcmask (!%p191_p9), 261120  }
   0xe   : > { %194 = sbr.rel (%p191_p9) target bundleno = 988 (0x3dc), region = 40  ;;  %745 = vmatprep.subr.mxu0 (!%p191_p9), %v225_v0  ;;  %v355_v3 = vld [vmem:[%s1232_s3] sm:$0xff] (!%p191_p9)  ;;  %v358_v7 = vld [vmem:[%s1232_s3 + $0x18] sm:$0xff] (!%p191_p9)  ;;  %v360_v10 = vld [vmem:[%s1232_s3 + $0x28] sm:$0xff] (!%p191_p9)  ;;  %vm331_vm2 = vcmask (!%p191_p9), 1046528   ;;  %s971_s6 = smov (!%p191_p9), 32  }
   0xf   : > { %746 = vmatpush3.msra.mxu0 (!%p191_p9), %v225_v0  ;;  %v804_v6 = vpack.c.bf16 (!%p191_p9), %v356_v4, %v355_v3  ;;  %v808_v8 = vpack.c.bf16 (!%p191_p9), %v358_v7, %v357_v5  ;;  %v359_v9 = vld [vmem:[%s1232_s3 + $0x20] sm:$0xff] (!%p191_p9)  ;;  %v361_v12 = vld [vmem:[%s1232_s3 + $0x30] sm:$0xff] (!%p191_p9)  ;;  %v362_v13 = vld [vmem:[%s1232_s3 + $0x38] sm:$0xff] (!%p191_p9)  ;;  %vm324_vm3 = vcmask (!%p191_p9), 1040384   ;;  %vm352_vm4 = vcmask (!%p191_p9), 523264   ;;  %s215_s26 = sand.u32 (!%p191_p9), 1, %s961_s19  }
  0x10   : > { %v812_v11 = vpack.c.bf16 (!%p191_p9), %v360_v10, %v359_v9  ;;  %v816_v14 = vpack.c.bf16 (!%p191_p9), %v362_v13, %v361_v12  ;;  %v685_v15 = vld [vmem:[%s1231_s2] ss:$0 sm:$0xff] (!%p191_p9)  ;;  %v364_v21 = vld [vmem:[%s1232_s3 + $0x48] sm:$0xff] (!%p191_p9)  ;;  %v365_v23 = vld [vmem:[%s1232_s3 + $0x50] sm:$0xff] (!%p191_p9)  ;;  %vm374_vm5 = vcmask (!%p191_p9), 785408   ;;  %s682_s30 = sshll.u32 (!%p191_p9), %s215_s26, 4 }
  0x11   : > { %805 = vmatprep.subr.bf16.mxu1 (!%p191_p9), %v804_v6  ;;  %v363_v20 = vld [vmem:[%s1232_s3 + $0x40] sm:$0xff] (!%p191_p9)  ;;  %v366_v24 = vld [vmem:[%s1232_s3 + $0x58] sm:$0xff] (!%p191_p9)  ;;  %v692_v47 = vld [vmem:[%s1232_s3 + $0x68] sm:$0xff] (!%p191_p9)  ;;  %s217_s9 = scalar_lea.vmem (!%p191_p9), [#allocation3], %s682_s30  ;;  %s1188_s14 = scalar_lea.sflag (!%p191_p9), [#allocation4], %s215_s26 }
  0x12   : > { %807 = vmatpush3.bf16.msra.mxu1 (!%p191_p9), %v804_v6  ;;  %v820_v22 = vpack.c.bf16 (!%p191_p9), %v364_v21, %v363_v20  ;;  %v824_v25 = vpack.c.bf16 (!%p191_p9), %v366_v24, %v365_v23  ;;  %v691_v46 = vld [vmem:[%s1232_s3 + $0x60] sm:$0xff] (!%p191_p9)  ;;  %v693_v48 = vld [vmem:[%s1232_s3 + $0x70] sm:$0xff] (!%p191_p9)  ;;  %v694_v50 = vld [vmem:[%s1232_s3 + $0x78] sm:$0xff] (!%p191_p9)  ;;  %s616_s10 = sshll.u32 (!%p191_p9), %s217_s9, 4  ;;  %s973_s15 = smov (!%p191_p9), [#allocation3]   ;;  %s1184_s10 = int_to_ptr.vmem [resolvable:$true] %s616_s10 }
  0x13   : > { %809 = vmatprep.subr.bf16.mxu1 (!%p191_p9), %v808_v8  ;;  %v828_v49 = vpack.c.bf16 (!%p191_p9), %v692_v47, %v691_v46  ;;  %v832_v51 = vpack.c.bf16 (!%p191_p9), %v694_v50, %v693_v48  ;;  %v695_v52 = vld [vmem:[%s1232_s3 + $0x80] sm:$0xff] (!%p191_p9)  ;;  %v696_v53 = vld [vmem:[%s1232_s3 + $0x88] sm:$0xff] (!%p191_p9)  ;;  %v697_v55 = vld [vmem:[%s1232_s3 + $0x90] sm:$0xff] (!%p191_p9)  ;;  %s911_s16 = sshll.u32 (!%p191_p9), %s973_s15, 4  ;;  %s912_s16 = int_to_ptr.vmem [resolvable:$false] %s911_s16 }
  0x14   : > { %v836_v54 = vpack.c.bf16 (!%p191_p9), %v696_v53, %v695_v52  ;;  %v698_v56 = vld [vmem:[%s1232_s3 + $0x98] sm:$0xff] (!%p191_p9)  ;;  %v699_v58 = vld [vmem:[%s1232_s3 + $0xa0] sm:$0xff] (!%p191_p9)  ;;  %v700_v59 = vld [vmem:[%s1232_s3 + $0xa8] sm:$0xff] (!%p191_p9)  ;;  %s913_s17 = scalar_lea.vmem (!%p191_p9), %s912_s16, 512  ;;  %p914_p0 = scmp.lt.s32.totalorder (!%p191_p9), %s1184_s10, %s912_s16 }
  0x15   : > { %s219_s7 = scalar_select %p218_p10, %s1027_s22, 1  ;;  %829 = vmatprep.subr.bf16.mxu0 %v828_v49  ;;  %v840_v57 = vpack.c.bf16 %v698_v56, %v697_v55  ;;  %v844_v60 = vpack.c.bf16 %v700_v59, %v699_v58  ;;  %v688_v61 = vld [vmem:[%s1233_s4] ss:$0 sm:$0xff]  ;;  %v702_v3 = vld [vmem:[%s1232_s3 + $0xb8] sm:$0xff] }
  0x16   : > { %811 = vmatpush3.bf16.msra.mxu1 %v808_v8 }
  0x17   : > { %s712_s8 = sshll.u32 %s219_s7, 4  ;;  %813 = vmatprep.subr.bf16.mxu1 %v812_v11  ;;  %s972_s7 = smov 64  }
  0x18   : > { %s222_s11 = scalar_lea.vmem %s1229_s0, %s712_s8  ;;  %s713_s8 = sshll.u32 %s1027_s22, 8 }
  0x19   : > { %v223_v1 = vld [vmem:[%s222_s11] sm:$0xff]  ;;  %v224_v2 = vld [vmem:[%s222_s11 + $0x8] sm:$0xff]  ;;  %s1182_s13 = scalar_lea.hbm %s1234_s5, %s713_s8  ;;  %s907_s22 = scalar_lea.vmem %s1184_s10, 256 }
  0x1a   : > { %747 = vmatprep.mubr.msk.f32.mxu0 %vm233_vm0, %v223_v1  ;;  %815 = vmatpush3.bf16.msra.mxu1 %v812_v11  ;;  %p908_p11 = scmp.ne.s32.totalorder %s1184_s10, %s907_s22  ;;  %p915_p1 = scmp.lt.s32.totalorder %s913_s17, %s907_s22 }
  0x1b   : > { %748 = vmatmul.mubr.msk.f32.vlgmr.msra.gmra.mrb[0].mxu0 %vm233_vm0, %v224_v2  ;;  %817 = vmatprep.subr.bf16.mxu1 %v816_v14  ;;  %v701_v2 = vld [vmem:[%s1232_s3 + $0xb0] sm:$0xff] }
  0x1c   : > { %831 = vmatpush3.bf16.msra.mxu0 %v828_v49  ;;  %v848_v4 = vpack.c.bf16 %v702_v3, %v701_v2  ;;  %p909_p12 = pnand %p908_p11, %p1044_p5  ;;  %p916_p2 = por %p915_p1, %p914_p0 }
  0x1d   : > { %833 = vmatprep.subr.bf16.mxu0 %v832_v51 }
  0x1e   : > { %819 = vmatpush3.bf16.msra.mxu1 %v816_v14  ;;  %p910_p13 = pneg %p909_p12 }
  0x1f   : > { %821 = vmatprep.subr.bf16.mxu1 %v820_v22 }
  0x20   : > { %835 = vmatpush3.bf16.msra.mxu0 %v832_v51  ;;  %p917_p3 = pnand %p916_p2, %p910_p13 }
  0x21   : > { %837 = vmatprep.subr.bf16.mxu0 %v836_v54 }
  0x22   : > { %823 = vmatpush3.bf16.msra.mxu1 %v820_v22 }
  0x23   : > { %825 = vmatprep.subr.bf16.mxu1 %v824_v25 }
  0x24   : > { %839 = vmatpush3.bf16.msra.mxu0 %v836_v54 }
  0x25   : > { %841 = vmatprep.subr.bf16.mxu0 %v840_v57 }
  0x26   : > { %827 = vmatpush3.bf16.msra.mxu1 %v824_v25  ;;  %v704_v25 = vld [vmem:[%s1233_s4 + $0x1] ss:$0 sm:$0xff] }
  0x28   : > { %843 = vmatpush3.bf16.msra.mxu0 %v840_v57 }
  0x29   : > { %845 = vmatprep.subr.bf16.mxu0 %v844_v60 }
  0x2c   : > { %847 = vmatpush3.bf16.msra.mxu0 %v844_v60 }
  0x2d   : > { %849 = vmatprep.subr.bf16.mxu0 %v848_v4 }
  0x30   : > { %851 = vmatpush3.bf16.msra.mxu0 %v848_v4 }
  0xee   : > { %v749_v16 = vpop.f32.mrb[0].mxu0 }
  0xef   : > { %v312_v17 = vadd.f32 %v749_v16, %v685_v15  ;;  %v306_v18 = vpop.f32.mrb[1].mxu0 }
  0xf0   : > { %v307_v19 = vadd.f32 %v685_v15, %v306_v18 }
  0xf1   : > { %895 = vtanh.f32 %v312_v17 }
  0xf2   : > { %897 = vtanh.f32 %v307_v19 }
  0xfb   : > { %v896_v26 = vpop.eup %895 }
  0xfc   : > { %v898_v27 = vpop.eup %897  ;;  %319 = vst.msk [vmem:[#allocation2 + $0x8] sm:$0xff] %vm317_vm1, %v896_v26 }
  0xfd   : > { %318 = vst.msk [vmem:[#allocation2] sm:$0xff] %vm317_vm1, %v898_v27 }
 0x103   : > { %v321_v28 = vld [vmem:[#allocation2 + $0x8] sm:$0xff] }
 0x104   : > { %v320_v29 = vld [vmem:[#allocation2] sm:$0xff]  ;;  %v333_v30 = vrot.slane %v321_v28, 1  ;;  %v326_v37 = vrot.slane %v321_v28, 7 }
 0x105   : > { %337 = vrot.lane.b32.xlu0 %v320_v29, %s971_s6  ;;  %v332_v31 = vrot.slane %v320_v29, 1  ;;  %v325_v34 = vrot.slane %v320_v29, 7 }
 0x106   : > { %v336_v33 = vsel %vm331_vm2, %v333_v30, 0.0 }
 0x107   : > { %v334_v32 = vsel %vm331_vm2, %v332_v31, %v333_v30  ;;  %v330_v36 = vsel %vm324_vm3, 0.0, %v325_v34  ;;  %v327_v42 = vsel %vm324_vm3, %v325_v34, %v326_v37 }
 0x108   : > { %344 = vrot.lane.b32.xlu1 %v334_v32, %s972_s7 }
 0x109   : > { %339 = vrot.lane.b32.xlu0 %v321_v28, %s971_s6 }
 0x10c   : > { %346 = vrot.lane.b32.xlu1 %v336_v33, %s972_s7 }
 0x177   : > { %v338_v35 = vpop.permute.xlu0 %337 }
 0x178   : > { %v350_v38 = vsel %vm317_vm1, %v330_v36, %v338_v35 }
 0x17a   : > { %v345_v39 = vpop.permute.xlu1 %344 }
 0x17b   : > { %v340_v40 = vpop.permute.xlu0 %339  ;;  %v353_v41 = vsel %vm352_vm4, %v350_v38, %v345_v39 }
 0x17c   : > { %774 = vmatprep.mubr.msk.f32.mxu1 %vm374_vm5, %v353_v41  ;;  %v351_v43 = vsel %vm317_vm1, %v327_v42, %v340_v40 }
 0x17e   : > { %v347_v44 = vpop.permute.xlu1 %346 }
 0x17f   : > { %v354_v45 = vsel %vm352_vm4, %v351_v43, %v347_v44 }
 0x180   : > { %775 = vmatmul.mubr.msk.f32.vlgmr.msra.gmra.mrb[0].mxu1 %vm374_vm5, %v354_v45 }
 0x253   : > { %v776_v62 = vpop.f32.mrb[0].mxu1 }
 0x254   : > { %v453_v63 = vadd.f32 %v776_v62, %v688_v61  ;;  %v447_v0 = vpop.f32.mrb[1].mxu1 }
 0x255   : > { %v448_v1 = vadd.f32 %v688_v61, %v447_v0 }
 0x256   : > { %899 = vtanh.f32 %v453_v63 }
 0x257   : > { %901 = vtanh.f32 %v448_v1 }
 0x260   : > { %v900_v5 = vpop.eup %899 }
 0x261   : > { %v902_v6 = vpop.eup %901  ;;  %459 = vst.msk [vmem:[#allocation2 + $0x8] sm:$0xff] %vm317_vm1, %v900_v5 }
 0x262   : > { %458 = vst.msk [vmem:[#allocation2] sm:$0xff] %vm317_vm1, %v902_v6 }
 0x268   : > { %v461_v7 = vld [vmem:[#allocation2 + $0x8] sm:$0xff] }
 0x269   : > { %477 = vrot.lane.b32.xlu1 %v461_v7, %s971_s6  ;;  %v460_v8 = vld [vmem:[#allocation2] sm:$0xff]  ;;  %v471_v9 = vrot.slane %v461_v7, 1  ;;  %v465_v15 = vrot.slane %v461_v7, 7 }
 0x26a   : > { %475 = vrot.lane.b32.xlu0 %v460_v8, %s971_s6  ;;  %v470_v10 = vrot.slane %v460_v8, 1  ;;  %v464_v13 = vrot.slane %v460_v8, 7 }
 0x26b   : > { %v474_v11 = vsel %vm331_vm2, %v471_v9, 0.0 }
 0x26c   : > { %v472_v12 = vsel %vm331_vm2, %v470_v10, %v471_v9  ;;  %v469_v17 = vsel %vm324_vm3, 0.0, %v464_v13  ;;  %v466_v19 = vsel %vm324_vm3, %v464_v13, %v465_v15 }
 0x26d   : > { %484 = vrot.lane.b32.xlu1 %v474_v11, %s972_s7 }
 0x26e   : > { %482 = vrot.lane.b32.xlu0 %v472_v12, %s972_s7 }
 0x2db   : > { %v478_v14 = vpop.permute.xlu1 %477 }
 0x2dc   : > { %v476_v16 = vpop.permute.xlu0 %475  ;;  %v489_v22 = vsel %vm317_vm1, %v466_v19, %v478_v14 }
 0x2dd   : > { %v488_v20 = vsel %vm317_vm1, %v469_v17, %v476_v16 }
 0x2df   : > { %v485_v18 = vpop.permute.xlu1 %484 }
 0x2e0   : > { %v483_v21 = vpop.permute.xlu0 %482  ;;  %v491_v24 = vsel %vm352_vm4, %v489_v22, %v485_v18 }
 0x2e1   : > { %v490_v23 = vsel %vm352_vm4, %v488_v20, %v483_v21 }
 0x2e2   : > { %801 = vmatprep.mubr.msk.f32.mxu0 %vm374_vm5, %v490_v23 }
 0x2e3   : > { %802 = vmatmul.mubr.msk.f32.vlgmr.msra.gmra.mrb[2].mxu0 %vm374_vm5, %v491_v24 }
 0x3b6   : > { %v803_v26 = vpop.f32.mrb[2].mxu0 }
 0x3b7   : > { %v591_v27 = vadd.f32 %v803_v26, %v704_v25  ;;  %v585_v28 = vpop.f32.mrb[3].mxu0 }
 0x3b8   : > { %v586_v29 = vadd.f32 %v704_v25, %v585_v28 }
 0x3b9   : > { %903 = vtanh.f32 %v591_v27 }
 0x3ba   : > { %905 = vtanh.f32 %v586_v29 }
 0x3c3   : > { %v904_v30 = vpop.eup %903 }
 0x3c4   : > { %v906_v31 = vpop.eup %905  ;;  %597 = vst.msk [vmem:[#allocation2 + $0x8] sm:$0xff] %vm317_vm1, %v904_v30 }
 0x3c5   : > { %596 = vst.msk [vmem:[#allocation2] sm:$0xff] %vm317_vm1, %v906_v31 }
 0x3cb   : > { %v599_v32 = vld [vmem:[#allocation2 + $0x8] sm:$0xff] }
 0x3cc   : > { %v598_v33 = vld [vmem:[#allocation2] sm:$0xff]  ;;  %601 = vst.msk [vmem:[%s217_s9 + $0x8] sm:$0xff] %vm317_vm1, %v599_v32 }
 0x3cd   : > { %600 = vst.msk [vmem:[%s217_s9] sm:$0xff] %vm317_vm1, %v598_v33 }
 0x3ce   : > { %920 = shalt.err (!%p917_p3)
}
 0x3cf   : > { %s921_s23 = scalar_lea.hbm %s1182_s13, 256  ;;  %s925_s7 = scalar_lea.hbm %s1234_s5, 512 }
 0x3d0   : > { %p922_p4 = scmp.ne.s32.totalorder %s1182_s13, %s921_s23  ;;  %p926_p9 = scmp.lt.u32.totalorder %s1182_s13, %s1234_s5 }
 0x3d1   : > { %p927_p10 = scmp.lt.u32.totalorder %s925_s7, %s921_s23  ;;  %p929_p12 = scmp.lt.u32.totalorder %s921_s23, %s1182_s13 }
 0x3d2   : > { %p923_p7 = pnand %p922_p4, %p1044_p5 }
 0x3d3   : > { %p928_p11 = por %p927_p10, %p926_p9 }
 0x3d4   : > { %p924_p8 = pneg %p923_p7 }
 0x3d5   : > { %p930_p13 = por %p929_p12, %p928_p11 }
 0x3d7   : > { %p931_p0 = pnand %p930_p13, %p924_p8 }
 0x3d9   : > { %934 = shalt.err (!%p931_p0)
}
 0x3da   : > { %s974_s8 = smov 128   ;;  %s975_s9 = smov 8  }
 0x3db   : > { %852 = dma.vmem_to_hbm [thread:$0]  (%p1044_p5), %s1184_s10, 256, %s1182_s13, %s1188_s14, %s974_s8, %s974_s8, %s975_s9  }
 0x3dc PF: > { %p858_p1 = scmp.ge.s32.totalorder %s969_s21, 2  ;;  %s631_s11 = sand.u32 1, %s957_s18  }
 0x3dd   : > { %s632_s12 = scalar_lea.sflag [#allocation4], %s631_s11 }
 0x3de   : > { %p855_p2 = pnand %p858_p1, %p1048_p6 }
 0x3e0   : > { %952 = dma.done.wait (!%p855_p2), %s632_s12, 256  }
 0x3e1   : > { %954 = vsyncadd (!%p855_p2), %s632_s12, 4294967040  ;;  %p15_p3 = scmp.ge.s32.totalorder %s1031_s24, 4   ;;  %s1237_s18 = smov %s961_s19 }
 0x3e2   : > { %s1238_s19 = smov %s965_s20  ;;  %s1239_s20 = smov %s1042_s27 }
 0x3e3   : > { %s1240_s21 = smov %s1031_s24  ;;  %17 = sbr.rel (!%p15_p3) target bundleno = 3 (0x3), region = 77 }
 0x3ea   :  { %637 = vsyncpa [#allocation4], 1 }
 0x3eb   :  { %639 = vsyncpa [#allocation4 + $0x1], 1 }

</bundles_post_ra>
